<compile_context>
chip_gen: v7x
topology: tpu7x:2x2x1
jax: 0.10.0
libtpu: 0.0.40
codegen_flags: <defaults>
</compile_context>

<pallas_src>
import functools

import jax
import jax.numpy as jnp
from jax.experimental import pallas as pl
from jax.experimental.pallas import tpu as pltpu

_LANE = 128               # lane width of a vreg
_SUBLANE = 8              # sublane count of a vreg (f32)
_ONES_LANE = _LANE - 1    # lane reserved to carry the constant 1.0 (bias fold)


def _round_up(x, m):
    return (x + m - 1) // m * m


def _rnn_fc_kernel(num_layers, x_ref, w_ref, o_ref):
    """x_ref : (PB, 128)                bf16  padded activations, lane 127 == 1.0
       w_ref : (num_layers+1, 128, 128) bf16  packed weights, bias folded into row 127
                                              (RNN layers first, then fc)
       o_ref : (PB, 128)                f32   padded output
    """
    h = x_ref[...]                                            # bf16 MXU operand
    for l in range(num_layers):
        pre = jnp.dot(h, w_ref[l], preferred_element_type=jnp.float32)  # includes bias via ones lane
        h = jnp.maximum(pre, 0.0).astype(jnp.bfloat16)        # relu in f32; lane 127 stays 1.0
    o_ref[...] = jnp.dot(h, w_ref[num_layers], preferred_element_type=jnp.float32)


def init_params(key, input_dim, hidden_dim, layer_dim, output_dim):
    """Natural-shape f32 params, PyTorch-style uniform(-1/sqrt(hidden), 1/sqrt(hidden)) init."""
    bound = 1.0 / jnp.sqrt(jnp.float32(hidden_dim))
    rnn_w, rnn_b = [], []
    for l in range(layer_dim):
        in_l = input_dim if l == 0 else hidden_dim
        key, k1, k2, k3 = jax.random.split(key, 4)
        w_ih = jax.random.uniform(k1, (hidden_dim, in_l), jnp.float32, -bound, bound)
        b_ih = jax.random.uniform(k2, (hidden_dim,), jnp.float32, -bound, bound)
        b_hh = jax.random.uniform(k3, (hidden_dim,), jnp.float32, -bound, bound)
        # W_hh_l is unused at seq_len=1 with h0=0 (only b_hh survives).
        rnn_w.append(w_ih.T)                    # (in_l, hidden)
        rnn_b.append((b_ih + b_hh)[None, :])    # (1, hidden)
    key, k1, k2 = jax.random.split(key, 3)
    w_fc = jax.random.uniform(k1, (output_dim, hidden_dim), jnp.float32, -bound, bound)
    b_fc = jax.random.uniform(k2, (output_dim,), jnp.float32, -bound, bound)
    return {
        "rnn_w": rnn_w,
        "rnn_b": rnn_b,
        "fc_w": w_fc.T,           # (hidden, output_dim)
        "fc_b": b_fc[None, :],    # (1, output_dim)
    }


def pack_params(params):
    """Zero-pad and pack weights (+ folded bias in row _ONES_LANE) into one bf16 slab.

    Batch-independent: the bias no longer gets pre-broadcast to PB rows.
    """
    num_layers = len(params["rnn_w"])
    for w in params["rnn_w"] + [params["fc_w"]]:
        assert w.shape[0] <= _ONES_LANE and w.shape[1] <= _ONES_LANE, \
            "dims must be <= 127 (one lane reserved for the bias fold); use a tiled grid otherwise"

    w_slab = jnp.zeros((num_layers + 1, _LANE, _LANE), jnp.float32)
    for l, (w, b) in enumerate(zip(params["rnn_w"], params["rnn_b"])):
        w_slab = w_slab.at[l, : w.shape[0], : w.shape[1]].set(w)
        w_slab = w_slab.at[l, _ONES_LANE, : b.shape[1]].set(b[0])     # bias row
        w_slab = w_slab.at[l, _ONES_LANE, _ONES_LANE].set(1.0)        # keep ones lane == 1 (relu(1)=1)
    wfc, bfc = params["fc_w"], params["fc_b"]
    w_slab = w_slab.at[num_layers, : wfc.shape[0], : wfc.shape[1]].set(wfc)
    w_slab = w_slab.at[num_layers, _ONES_LANE, : bfc.shape[1]].set(bfc[0])

    return {
        "w_slab": w_slab.astype(jnp.bfloat16),   # bf16 MXU operand; padded rows/cols are zero
        "num_layers": num_layers,
        "output_dim": params["fc_w"].shape[1],
    }


@functools.partial(jax.jit, static_argnames=("num_layers", "output_dim"))
def rnn_model_forward(x, w_slab, *, num_layers, output_dim):
    batch, input_dim = x.shape
    assert input_dim <= _ONES_LANE
    pb = _round_up(max(batch, 1), _SUBLANE)

    # Pad activations, set the reserved ones lane, cast to bf16 — all fused under this jit.
    x_pad = (jnp.zeros((pb, _LANE), jnp.float32)
             .at[:batch, :input_dim].set(x)
             .at[:, _ONES_LANE].set(1.0)
             .astype(jnp.bfloat16))

    kernel = functools.partial(_rnn_fc_kernel, num_layers)
    vmem_spec = pl.BlockSpec(memory_space=pltpu.MemorySpace.VMEM)

    flops = 2 * pb * _LANE * _LANE * (num_layers + 1)
    bytes_accessed = x_pad.size * 2 + w_slab.size * 2 + pb * _LANE * 4

    out_pad = pl.pallas_call(
        kernel,
        out_shape=jax.ShapeDtypeStruct((pb, _LANE), jnp.float32),
        in_specs=[vmem_spec, vmem_spec],
        out_specs=vmem_spec,
        cost_estimate=pl.CostEstimate(
            flops=flops, transcendentals=0, bytes_accessed=bytes_accessed),
    )(x_pad, w_slab)

    # Padded weight columns are zero, so padding never leaks into valid lanes; slice back.
    return out_pad[:batch, :output_dim]


def reference_forward_bf16(x, params):
    """Pure-JAX reference mirroring the kernel math (bf16 operands incl. bias, f32 accumulate)."""
    h = x.astype(jnp.bfloat16)
    for w, b in zip(params["rnn_w"], params["rnn_b"]):
        pre = (jnp.dot(h, w.astype(jnp.bfloat16), preferred_element_type=jnp.float32)
               + b.astype(jnp.bfloat16).astype(jnp.float32))
        h = jnp.maximum(pre, 0.0).astype(jnp.bfloat16)
    return (jnp.dot(h, params["fc_w"].astype(jnp.bfloat16), preferred_element_type=jnp.float32)
            + params["fc_b"].astype(jnp.bfloat16).astype(jnp.float32))


def reference_forward_f32(x, params):
    """Full-precision reference of the original module semantics."""
    h = x
    for w, b in zip(params["rnn_w"], params["rnn_b"]):
        h = jnp.maximum(h @ w + b, 0.0)
    return h @ params["fc_w"] + params["fc_b"]


if __name__ == "__main__":
    input_dim, hidden_dim, layer_dim, output_dim = 16, 32, 2, 10
    batch = 2

    key = jax.random.PRNGKey(0)
    key, kx = jax.random.split(key)
    x = jax.random.normal(kx, (batch, input_dim), jnp.float32)

    params = init_params(key, input_dim, hidden_dim, layer_dim, output_dim)
    packed = pack_params(params)

    out = rnn_model_forward(x, packed["w_slab"],
                            num_layers=packed["num_layers"],
                            output_dim=packed["output_dim"])
    out = jax.block_until_ready(out)
    assert out.shape == (batch, output_dim)

    # Exact-path check (same bf16 operands / f32 accumulation as the kernel; small
    # tolerance for f32 accumulation-order differences from the bias fold).
    ref_bf16 = reference_forward_bf16(x, params)
    assert jnp.allclose(out, ref_bf16, atol=1e-3, rtol=1e-3)

    # Semantics check against the pure-f32 module (looser: bf16 weight/bias rounding).
    ref_f32 = reference_forward_f32(x, params)
    assert jnp.allclose(out, ref_f32, atol=5e-2, rtol=5e-2)

    print("KERNEL_OK")
</pallas_src>

<mosaic_0001>
module attributes {stable_mosaic.version = 11 : i64} {
  func.func @_rnn_fc_kernel(%arg0: memref<8x128xbf16, #tpu.memory_space<vmem>>, %arg1: memref<3x128x128xbf16, #tpu.memory_space<vmem>>, %arg2: memref<8x128xf32, #tpu.memory_space<vmem>>) attributes {dimension_semantics = [], scalar_prefetch = 0 : i64, scratch_operands = 0 : i64, tpu.core_type = #tpu.core_type<tc>} {
    %c0 = arith.constant 0 : index
    %c0_0 = arith.constant 0 : index
    %0 = vector.load %arg0[%c0, %c0_0] : memref<8x128xbf16, #tpu.memory_space<vmem>>, vector<8x128xbf16>
    %c0_1 = arith.constant 0 : index
    %c0_2 = arith.constant 0 : index
    %c0_3 = arith.constant 0 : index
    %1 = vector.load %arg1[%c0_1, %c0_2, %c0_3] : memref<3x128x128xbf16, #tpu.memory_space<vmem>>, vector<1x128x128xbf16>
    %2 = vector.shape_cast %1 : vector<1x128x128xbf16> to vector<128x128xbf16>
    %cst = arith.constant dense<0.000000e+00> : vector<8x128xf32>
    %3 = tpu.matmul %0, %2, %cst {dimension_numbers = #tpu.dot_dimension_numbers<[1], [0], [0], [1], [0, 0, 1, 1], [], []>} : vector<8x128xbf16>, vector<128x128xbf16>, vector<8x128xf32> -> vector<8x128xf32>
    %cst_4 = arith.constant 0.000000e+00 : f32
    %4 = vector.broadcast %cst_4 : f32 to vector<8x128xf32>
    %5 = arith.maximumf %3, %4 : vector<8x128xf32>
    %6 = arith.truncf %5 : vector<8x128xf32> to vector<8x128xbf16>
    %c1 = arith.constant 1 : index
    %c0_5 = arith.constant 0 : index
    %c0_6 = arith.constant 0 : index
    %7 = vector.load %arg1[%c1, %c0_5, %c0_6] : memref<3x128x128xbf16, #tpu.memory_space<vmem>>, vector<1x128x128xbf16>
    %8 = vector.shape_cast %7 : vector<1x128x128xbf16> to vector<128x128xbf16>
    %cst_7 = arith.constant dense<0.000000e+00> : vector<8x128xf32>
    %9 = tpu.matmul %6, %8, %cst_7 {dimension_numbers = #tpu.dot_dimension_numbers<[1], [0], [0], [1], [0, 0, 1, 1], [], []>} : vector<8x128xbf16>, vector<128x128xbf16>, vector<8x128xf32> -> vector<8x128xf32>
    %cst_8 = arith.constant 0.000000e+00 : f32
    %10 = vector.broadcast %cst_8 : f32 to vector<8x128xf32>
    %11 = arith.maximumf %9, %10 : vector<8x128xf32>
    %12 = arith.truncf %11 : vector<8x128xf32> to vector<8x128xbf16>
    %c2 = arith.constant 2 : index
    %c0_9 = arith.constant 0 : index
    %c0_10 = arith.constant 0 : index
    %13 = vector.load %arg1[%c2, %c0_9, %c0_10] : memref<3x128x128xbf16, #tpu.memory_space<vmem>>, vector<1x128x128xbf16>
    %14 = vector.shape_cast %13 : vector<1x128x128xbf16> to vector<128x128xbf16>
    %cst_11 = arith.constant dense<0.000000e+00> : vector<8x128xf32>
    %15 = tpu.matmul %12, %14, %cst_11 {dimension_numbers = #tpu.dot_dimension_numbers<[1], [0], [0], [1], [0, 0, 1, 1], [], []>} : vector<8x128xbf16>, vector<128x128xbf16>, vector<8x128xf32> -> vector<8x128xf32>
    %c0_12 = arith.constant 0 : index
    %c0_13 = arith.constant 0 : index
    %16 = vector.load %arg2[%c0_12, %c0_13] : memref<8x128xf32, #tpu.memory_space<vmem>>, vector<8x128xf32>
    tpu.vector_store %arg2[%c0_12, %c0_13], %15 {strides = array<i32>} : memref<8x128xf32, #tpu.memory_space<vmem>>, vector<8x128xf32>,
    return
  }
}

</mosaic_0001>

<bundles_post_ra>
// kernel: rnn_model_forward.1
= control target key start
LH: loop header
LB: loop body
LE: loop exit
PB: predicated region body
PF: predicated region fallthrough
CT: control target
= control target key end

     0   :  { %7 = vsyncpa [#allocation3], 0  ;;  %s515_s9 = smov [#allocation2]   ;;  %s583_s0 = inlined_call_operand.vmem [shape: bf16[8,128], index: 0, kind: input, shape index: {}]   ;;  %s584_s1 = inlined_call_operand.hbm [shape: bf16[3,128,128], index: 1, kind: input, shape index: {}]   ;;  %s585_s2 = inlined_call_operand.vmem [shape: f32[8,128], index: 2, kind: output, shape index: {}]  }
   0x1   :  { %s15_s10 = sshll.u32 %s515_s9, 4  ;;  %s491_s13 = scalar_lea.hbm %s584_s1, 3072  ;;  %s16_s10 = int_to_ptr.vmem [resolvable:$true] %s15_s10 }
   0x2   :  { %p492_p0 = scmp.ne.s32.totalorder %s584_s1, %s491_s13  ;;  %p495_p1 = scmp.lt.u32.totalorder %s491_s13, %s584_s1 }
   0x4   :  { %p497_p2 = pnand %p495_p1, %p492_p0 }
   0x6   :  { %500 = shalt.err (!%p497_p2)
}
   0x7   :  { %s501_s18 = scalar_lea.vmem %s16_s10, 3072  ;;  %p506_p4 = scmp.lt.s32.totalorder %s16_s10, %s16_s10 }
   0x8   :  { %p502_p3 = scmp.ne.s32.totalorder %s16_s10, %s501_s18  ;;  %p507_p5 = scmp.lt.s32.totalorder %s501_s18, %s501_s18 }
   0xa   :  { %p508_p6 = por %p507_p5, %p506_p4 }
   0xc   :  { %p509_p7 = pnand %p508_p6, %p502_p3 }
   0xe   :  { %512 = shalt.err (!%p509_p7)
}
   0xf   :  { %s516_s19 = smov 64   ;;  %s517_s20 = smov 4  }
  0x10   :  { %21 = dma.hbm_to_vmem [thread:$0]  %s584_s1, 3072, %s16_s10, [#allocation3], %s516_s19, %s516_s19, %s517_s20  }
  0x11   :  { %513 = dma.done.wait [#allocation3], 3072  }
  0x12   :  { %514 = vsyncadd [#allocation3], 4294964224  ;;  %v518_v0 = vmov 0.0   ;;  %vm519_vm0 = vmmov 0   ;;  %v467_v1 = vld [vmem:[#allocation2] sm:$0xff]   ;;  %v468_v2 = vld [vmem:[#allocation2 + $0x8] sm:$0xff]  }
  0x13   :  { %402 = vmatprep.subr.bf16.mxu0 %v518_v0  ;;  %418 = vmatprep.mubr.msk.bf16.mxu0 %vm519_vm0, %v518_v0  ;;  %v469_v3 = vld [vmem:[#allocation2 + $0x10] sm:$0xff]   ;;  %v475_v4 = vld [vmem:[#allocation2 + $0x40] sm:$0xff]   ;;  %v470_v5 = vld [vmem:[#allocation2 + $0x18] sm:$0xff]  }
  0x14   :  { %422 = vmatprep.subr.bf16.mxu1 %v518_v0  ;;  %438 = vmatprep.mubr.msk.bf16.mxu1 %vm519_vm0, %v518_v0  ;;  %v476_v6 = vld [vmem:[#allocation2 + $0x48] sm:$0xff]   ;;  %v471_v7 = vld [vmem:[#allocation2 + $0x20] sm:$0xff]   ;;  %v477_v8 = vld [vmem:[#allocation2 + $0x50] sm:$0xff]  }
  0x15   :  { %403 = vmatpush3.bf16.msra.mxu0 %v467_v1  ;;  %423 = vmatpush3.bf16.msra.mxu1 %v475_v4  ;;  %v472_v9 = vld [vmem:[#allocation2 + $0x28] sm:$0xff]   ;;  %v478_v10 = vld [vmem:[#allocation2 + $0x58] sm:$0xff]   ;;  %v473_v11 = vld [vmem:[#allocation2 + $0x30] sm:$0xff]  }
  0x16   :  { %404 = vmatprep.subr.bf16.mxu0 %v518_v0  ;;  %424 = vmatprep.subr.bf16.mxu1 %v518_v0  ;;  %v479_v12 = vld [vmem:[#allocation2 + $0x60] sm:$0xff]   ;;  %v474_v13 = vld [vmem:[#allocation2 + $0x38] sm:$0xff]   ;;  %v480_v14 = vld [vmem:[#allocation2 + $0x68] sm:$0xff]  }
  0x17   :  { %v26_v15 = vld [vmem:[%s583_s0] sm:$0xf]  ;;  %v481_v16 = vld [vmem:[#allocation2 + $0x70] sm:$0xff]   ;;  %v483_v18 = vld [vmem:[#allocation2 + $0x80] sm:$0xff]  }
  0x18   :  { %v482_v17 = vld [vmem:[#allocation2 + $0x78] sm:$0xff]   ;;  %v484_v19 = vld [vmem:[#allocation2 + $0x88] sm:$0xff]   ;;  %v485_v20 = vld [vmem:[#allocation2 + $0x90] sm:$0xff]  }
  0x19   :  { %405 = vmatpush3.bf16.msra.mxu0 %v468_v2  ;;  %425 = vmatpush3.bf16.msra.mxu1 %v476_v6  ;;  %v486_v21 = vld [vmem:[#allocation2 + $0x98] sm:$0xff]   ;;  %v487_v22 = vld [vmem:[#allocation2 + $0xa0] sm:$0xff]   ;;  %v488_v23 = vld [vmem:[#allocation2 + $0xa8] sm:$0xff]  }
  0x1a   :  { %406 = vmatprep.subr.bf16.mxu0 %v518_v0  ;;  %426 = vmatprep.subr.bf16.mxu1 %v518_v0  ;;  %v489_v24 = vld [vmem:[#allocation2 + $0xb0] sm:$0xff]   ;;  %v490_v31 = vld [vmem:[#allocation2 + $0xb8] sm:$0xff]  }
  0x1d   :  { %407 = vmatpush3.bf16.msra.mxu0 %v469_v3  ;;  %427 = vmatpush3.bf16.msra.mxu1 %v477_v8 }
  0x1e   :  { %408 = vmatprep.subr.bf16.mxu0 %v518_v0  ;;  %428 = vmatprep.subr.bf16.mxu1 %v518_v0 }
  0x21   :  { %409 = vmatpush3.bf16.msra.mxu0 %v470_v5  ;;  %429 = vmatpush3.bf16.msra.mxu1 %v478_v10 }
  0x22   :  { %410 = vmatprep.subr.bf16.mxu0 %v518_v0  ;;  %430 = vmatprep.subr.bf16.mxu1 %v518_v0 }
  0x25   :  { %411 = vmatpush3.bf16.msra.mxu0 %v471_v7  ;;  %431 = vmatpush3.bf16.msra.mxu1 %v479_v12 }
  0x26   :  { %412 = vmatprep.subr.bf16.mxu0 %v518_v0  ;;  %432 = vmatprep.subr.bf16.mxu1 %v518_v0 }
  0x29   :  { %413 = vmatpush3.bf16.msra.mxu0 %v472_v9  ;;  %433 = vmatpush3.bf16.msra.mxu1 %v480_v14 }
  0x2a   :  { %414 = vmatprep.subr.bf16.mxu0 %v518_v0  ;;  %434 = vmatprep.subr.bf16.mxu1 %v518_v0 }
  0x2d   :  { %415 = vmatpush3.bf16.msra.mxu0 %v473_v11  ;;  %435 = vmatpush3.bf16.msra.mxu1 %v481_v16 }
  0x2e   :  { %416 = vmatprep.subr.bf16.mxu0 %v518_v0  ;;  %436 = vmatprep.subr.bf16.mxu1 %v518_v0 }
  0x31   :  { %417 = vmatpush3.bf16.msra.mxu0 %v474_v13  ;;  %437 = vmatpush3.bf16.msra.mxu1 %v482_v17 }
  0x32   :  { %442 = vmatprep.subr.bf16.mxu0 %v518_v0 }
  0x34   :  { %419 = vmatmul.mubr.bf16.vlgmr.msra.gmra.mrb[0].mxu0 %v26_v15 }
  0x35   :  { %458 = vmatprep.mubr.msk.bf16.mxu0 %vm519_vm0, %v518_v0  ;;  %443 = vmatpush3.bf16.msra.mxu0 %v483_v18 }
  0x36   :  { %444 = vmatprep.subr.bf16.mxu0 %v518_v0 }
  0x39   :  { %445 = vmatpush3.bf16.msra.mxu0 %v484_v19 }
  0x3a   :  { %446 = vmatprep.subr.bf16.mxu0 %v518_v0 }
  0x3d   :  { %447 = vmatpush3.bf16.msra.mxu0 %v485_v20 }
  0x3e   :  { %448 = vmatprep.subr.bf16.mxu0 %v518_v0 }
  0x41   :  { %449 = vmatpush3.bf16.msra.mxu0 %v486_v21 }
  0x42   :  { %450 = vmatprep.subr.bf16.mxu0 %v518_v0 }
  0x45   :  { %451 = vmatpush3.bf16.msra.mxu0 %v487_v22 }
  0x46   :  { %452 = vmatprep.subr.bf16.mxu0 %v518_v0 }
  0x49   :  { %453 = vmatpush3.bf16.msra.mxu0 %v488_v23 }
  0x4a   :  { %454 = vmatprep.subr.bf16.mxu0 %v518_v0 }
  0x4d   :  { %455 = vmatpush3.bf16.msra.mxu0 %v489_v24 }
  0x4e   :  { %456 = vmatprep.subr.bf16.mxu0 %v518_v0 }
  0x51   :  { %457 = vmatpush3.bf16.msra.mxu0 %v490_v31 }
 0x107   :  { %v125_v25 = vpop.f32.mrb[0].mxu0 }
 0x108   :  { %v131_v26 = vmax.f32 %v125_v25, 0.0  ;;  %v420_v27 = vpop.f32.mrb[1].mxu0 }
 0x109   :  { %v128_v28 = vpop.f32.mrb[2].mxu0 }
 0x10a   :  { %v132_v29 = vpack.c.bf16 %v131_v26, %v131_v26  ;;  %v421_v30 = vpop.f32.mrb[3].mxu0 }
 0x10c   :  { %439 = vmatmul.mubr.bf16.vlgmr.msra.gmra.mrb[0].mxu1 %v132_v29 }
 0x1df   :  { %v232_v32 = vpop.f32.mrb[0].mxu1 }
 0x1e0   :  { %v238_v33 = vmax.f32 %v232_v32, 0.0  ;;  %v440_v34 = vpop.f32.mrb[1].mxu1 }
 0x1e1   :  { %v235_v35 = vpop.f32.mrb[2].mxu1 }
 0x1e2   :  { %v239_v36 = vpack.c.bf16 %v238_v33, %v238_v33  ;;  %v441_v37 = vpop.f32.mrb[3].mxu1 }
 0x1e4   :  { %459 = vmatmul.mubr.bf16.vlgmr.msra.gmra.mrb[4].mxu0 %v239_v36 }
 0x2b7   :  { %v339_v38 = vpop.f32.mrb[4].mxu0 }
 0x2b8   :  { %345 = vst [vmem:[%s585_s2] sm:$0xff] %v339_v38  ;;  %v460_v39 = vpop.f32.mrb[5].mxu0 }
 0x2b9   :  { %v342_v40 = vpop.f32.mrb[6].mxu0 }
 0x2ba   :  { %v461_v41 = vpop.f32.mrb[7].mxu0 }
 0x2bb   :  { %350 = vsyncpa [#allocation3], 1 }

</bundles_post_ra>
